<compile_context>
chip_gen: v7x
topology: tpu7x:2x2x1
jax: 0.10.0
libtpu: 0.0.40
codegen_flags: <defaults>
</compile_context>

<pallas_src>
import jax
import jax.numpy as jnp
import numpy as np
from jax.experimental import pallas as pl
from jax.experimental.pallas import tpu as pltpu

# ----------------------------- config ---------------------------------------
B = 2            # batch
S = 8            # sequence length
H = 32           # hidden size
NH = 4           # num attention heads
HS = H // NH     # head size (8)
HQ = NH * HS     # packed head width (32)
ROTARY_PCT = 0.5
R = int(HS * ROTARY_PCT)          # rotary_ndims (4)
ROTARY_BASE = 10000.0
INV_NORM = 1.0 / float(np.sqrt(HS))   # 1 / norm_factor
NEG = -1e30                            # bounded mask sentinel (never -inf)


# ----------------------------- kernel ---------------------------------------
def _attn_kernel(x_ref, mask_ref, pad_ref, cos_ref, sin_ref,
                 w_ref, b_ref, wd_ref, bd_ref, o_ref):
    """Single block: all B*S rows at once.

    x_ref    : (N, H)          hidden states (rows = tokens, batch folded in)
    mask_ref : (N, N)          static block-diagonal causal mask (0 / NEG)
    pad_ref  : (1, N)          runtime additive padding mask (per key column)
    cos_ref  : (N, NH*HS)      rotary cos, padded to head width & tiled per head
    sin_ref  : (N, NH*HS)      rotary sin, padded & tiled per head
    w_ref    : (H, 5*NH*HS)    fused [Q | Q@P | K | K@P | V] projection
    b_ref    : (1, 5*NH*HS)    fused bias
    wd_ref   : (H, H)          dense output projection
    bd_ref   : (1, H)
    o_ref    : (N, H)
    """
    x = x_ref[...]                                              # (N, H)

    # One fused projection matmul + one bias add.
    proj = jnp.dot(x, w_ref[...],
                   preferred_element_type=jnp.float32) + b_ref[...]   # (N, 5*HQ)

    cos = cos_ref[...]                                          # (N, HQ)
    sin = sin_ref[...]

    # RoPE: pure VPU FMAs (P already folded into the weights; pass-through
    # dims have cos=1, sin=0).
    q_all = proj[:, 0 * HQ:1 * HQ] * cos + proj[:, 1 * HQ:2 * HQ] * sin
    k_all = proj[:, 2 * HQ:3 * HQ] * cos + proj[:, 3 * HQ:4 * HQ] * sin
    v_all = proj[:, 4 * HQ:5 * HQ]

    # Combined additive mask (static causal/block-diag + runtime padding).
    mask = mask_ref[...] + pad_ref[...]                         # (N, N)

    wd = wd_ref[...]                                            # (H, H)

    out = None
    for h in range(NH):                                         # NH = 4, static
        lo, hi = h * HS, (h + 1) * HS
        q = q_all[:, lo:hi]                                     # (N, HS)
        k = k_all[:, lo:hi]
        v = v_all[:, lo:hi]

        s = jnp.einsum('qd,kd->qk', q, k,
                       preferred_element_type=jnp.float32) * INV_NORM
        s = s + mask                                            # (N, N)

        # softmax over keys; reciprocal on the EUP + one Newton step.
        m = jnp.max(s, axis=-1, keepdims=True)
        e = jnp.exp(s - m)
        den = jnp.sum(e, axis=-1, keepdims=True)
        r = pl.reciprocal(den, approx=True)
        r = r * (2.0 - den * r)                                 # Newton refine
        p = e * r

        ctx = jnp.einsum('qk,kd->qd', p, v,
                         preferred_element_type=jnp.float32)    # (N, HS)

        contrib = jnp.dot(ctx, wd[lo:hi, :],
                          preferred_element_type=jnp.float32)   # (N, H)
        out = contrib if out is None else out + contrib

    o_ref[...] = (out + bd_ref[...]).astype(o_ref.dtype)


# ----------------------------- factory ---------------------------------------
def make_gpt_neox_attention(wqkv, bqkv, wd, bd, cos, sin, *, batch=B, seq=S):
    """One-time precompute (weight fusion, masks, rotary caches) + jitted call.

    Per-call path only reshapes activations and the additive padding mask.
    """
    n = batch * seq

    # ---- de-interleave QKV and fold the rotate-half permutation ------------
    w4 = wqkv.reshape(H, NH, 3, HS)                  # interleaved [q|k|v]/head
    b4 = bqkv.reshape(NH, 3, HS)

    p_np = np.zeros((HS, HS), np.float32)
    half = R // 2
    for j in range(half):
        p_np[j + half, j] = -1.0                     # rot[j] = -t[j+half]
    for j in range(half, R):
        p_np[j - half, j] = 1.0                      # rot[j] =  t[j-half]
    P = jnp.asarray(p_np)

    wq, wk, wv = w4[:, :, 0, :], w4[:, :, 1, :], w4[:, :, 2, :]   # (H, NH, HS)
    bq, bk, bv = b4[:, 0, :], b4[:, 1, :], b4[:, 2, :]            # (NH, HS)

    flat = lambda w3: w3.reshape(H, NH * HS)
    w_big = jnp.concatenate(
        [flat(wq), flat(wq @ P), flat(wk), flat(wk @ P), flat(wv)], axis=1)
    b_big = jnp.concatenate(
        [bq.reshape(-1), (bq @ P).reshape(-1),
         bk.reshape(-1), (bk @ P).reshape(-1),
         bv.reshape(-1)]).reshape(1, 5 * NH * HS)
    bd_2d = bd.reshape(1, H)

    # ---- rotary caches: pad to head width, tile over batch rows & heads ----
    cos_hs = jnp.concatenate([cos, jnp.ones((seq, HS - R), jnp.float32)], -1)
    sin_hs = jnp.concatenate([sin, jnp.zeros((seq, HS - R), jnp.float32)], -1)
    cos_t = jnp.tile(jnp.tile(cos_hs, (batch, 1)), (1, NH))       # (n, HQ)
    sin_t = jnp.tile(jnp.tile(sin_hs, (batch, 1)), (1, NH))

    # ---- static block-diagonal causal mask (batch folded into rows) --------
    bidx = np.arange(n) // seq
    sidx = np.arange(n) % seq
    allowed = (bidx[:, None] == bidx[None, :]) & (sidx[None, :] <= sidx[:, None])
    mask_static = jnp.asarray(np.where(allowed, 0.0, NEG).astype(np.float32))

    # ---- pallas_call (single grid step; everything fits VMEM easily) -------
    c2 = lambda i: (0, 0)
    kernel_fn = pl.pallas_call(
        _attn_kernel,
        out_shape=jax.ShapeDtypeStruct((n, H), jnp.float32),
        grid=(1,),
        in_specs=[
            pl.BlockSpec((n, H), c2),                # x (batch folded)
            pl.BlockSpec((n, n), c2),                # static causal/block mask
            pl.BlockSpec((1, n), c2),                # runtime padding mask
            pl.BlockSpec((n, HQ), c2),               # cos (tiled)
            pl.BlockSpec((n, HQ), c2),               # sin (tiled)
            pl.BlockSpec((H, 5 * HQ), c2),           # fused projection weight
            pl.BlockSpec((1, 5 * HQ), c2),           # fused projection bias
            pl.BlockSpec((H, H), c2),                # dense weight
            pl.BlockSpec((1, H), c2),                # dense bias
        ],
        out_specs=pl.BlockSpec((n, H), c2),
        compiler_params=pltpu.CompilerParams(
            dimension_semantics=("arbitrary",)),
    )

    @jax.jit
    def attn(hidden, attn_mask_add):
        x = hidden.reshape(n, H)
        pad = attn_mask_add.reshape(1, n)
        out = kernel_fn(x, mask_static, pad, cos_t, sin_t,
                        w_big, b_big, wd, bd_2d)
        return out.reshape(batch, seq, H)

    return attn


# ------------------------- pure-JAX reference --------------------------------
def reference(hidden, attn_mask_4d, cos, sin, wqkv, bqkv, wd, bd):
    qkv = hidden @ wqkv + bqkv[0]                              # (B,S,3H)
    qkv = qkv.reshape(B, S, NH, 3 * HS)
    q = qkv[..., :HS].transpose(0, 2, 1, 3)                    # (B,NH,S,HS)
    k = qkv[..., HS:2 * HS].transpose(0, 2, 1, 3)
    v = qkv[..., 2 * HS:].transpose(0, 2, 1, 3)

    def rope(t):
        tr, tp = t[..., :R], t[..., R:]
        rot = jnp.concatenate([-tr[..., R // 2:], tr[..., :R // 2]], -1)
        return jnp.concatenate([tr * cos + rot * sin, tp], -1)

    q, k = rope(q), rope(k)
    scores = jnp.einsum("bhqd,bhkd->bhqk", q, k) / float(np.sqrt(HS))
    causal = jnp.tril(jnp.ones((S, S), bool))
    scores = jnp.where(causal, scores, jnp.finfo(jnp.float32).min)
    scores = scores + attn_mask_4d                             # (B,1,1,S)
    w = jax.nn.softmax(scores, axis=-1)
    ctx = jnp.einsum("bhqk,bhkd->bhqd", w, v)
    ctx = ctx.transpose(0, 2, 1, 3).reshape(B, S, H)
    return ctx @ wd + bd[0]


# ----------------------------- main ------------------------------------------
if __name__ == "__main__":
    key = jax.random.PRNGKey(0)
    k_h, k_wqkv, k_bqkv, k_wd, k_bd = jax.random.split(key, 5)

    hidden = jax.random.normal(k_h, (B, S, H), jnp.float32)
    wqkv = jax.random.normal(k_wqkv, (H, 3 * H), jnp.float32) * 0.1
    bqkv = jax.random.normal(k_bqkv, (1, 3 * H), jnp.float32) * 0.1
    wd = jax.random.normal(k_wd, (H, H), jnp.float32) * 0.1
    bd = jax.random.normal(k_bd, (1, H), jnp.float32) * 0.1

    # Additive attention mask (B,1,1,S): mask out last key position of batch 1.
    attn_mask = jnp.zeros((B, 1, 1, S), jnp.float32)
    attn_mask = attn_mask.at[1, 0, 0, S - 1].set(-1e9)

    # RotaryEmbedding cos/sin cache (positions 0..S-1), exactly per the module.
    inv_freq = 1.0 / (ROTARY_BASE ** (jnp.arange(0, R, 2, dtype=jnp.float32) / R))
    t = jnp.arange(S, dtype=jnp.float32)
    freqs = jnp.einsum("i,j->ij", t, inv_freq)                 # (S, R/2)
    emb = jnp.concatenate([freqs, freqs], axis=-1)             # (S, R)
    cos = jnp.cos(emb)
    sin = jnp.sin(emb)

    # One-time precompute (weight fusion / masks / rotary caches), then call.
    attn = make_gpt_neox_attention(wqkv, bqkv, wd, bd, cos, sin)
    out = attn(hidden, attn_mask[:, 0, 0, :])
    out = jax.block_until_ready(out)

    ref = reference(hidden, attn_mask, cos, sin, wqkv, bqkv, wd, bd)
    np.testing.assert_allclose(np.asarray(out), np.asarray(ref),
                               atol=1e-4, rtol=1e-4)

    # TODO(synk): layer_past / use_cache (KV-cache concat), head_mask and the
    # RotaryEmbedding cache-regrow branch (seq_len > max cached) are host-side
    # setup / not exercised here (forward defaults: layer_past=None,
    # use_cache=False).
    print("KERNEL_OK")
</pallas_src>

<mosaic_0001>
module attributes {stable_mosaic.version = 11 : i64} {
  func.func @_attn_kernel(%arg0: i32, %arg1: memref<16x32xf32, #tpu.memory_space<vmem>>, %arg2: memref<16x16xf32, #tpu.memory_space<vmem>>, %arg3: memref<1x16xf32, #tpu.memory_space<vmem>>, %arg4: memref<16x32xf32, #tpu.memory_space<vmem>>, %arg5: memref<16x32xf32, #tpu.memory_space<vmem>>, %arg6: memref<32x160xf32, #tpu.memory_space<vmem>>, %arg7: memref<1x160xf32, #tpu.memory_space<vmem>>, %arg8: memref<32x32xf32, #tpu.memory_space<vmem>>, %arg9: memref<1x32xf32, #tpu.memory_space<vmem>>, %arg10: memref<16x32xf32, #tpu.memory_space<vmem>>) attributes {dimension_semantics = [#tpu.dimension_semantics<arbitrary>], iteration_bounds = array<i64: 1>, scalar_prefetch = 0 : i64, scratch_operands = 0 : i64, tpu.core_type = #tpu.core_type<tc>, window_params = [{pipeline_mode = #tpu.pipeline_mode<synchronous>, transform_indices = @transform_0, window_bounds = array<i64: 16, 32>}, {pipeline_mode = #tpu.pipeline_mode<synchronous>, transform_indices = @transform_1, window_bounds = array<i64: 16, 16>}, {pipeline_mode = #tpu.pipeline_mode<synchronous>, transform_indices = @transform_2, window_bounds = array<i64: 1, 16>}, {pipeline_mode = #tpu.pipeline_mode<synchronous>, transform_indices = @transform_3, window_bounds = array<i64: 16, 32>}, {pipeline_mode = #tpu.pipeline_mode<synchronous>, transform_indices = @transform_4, window_bounds = array<i64: 16, 32>}, {pipeline_mode = #tpu.pipeline_mode<synchronous>, transform_indices = @transform_5, window_bounds = array<i64: 32, 160>}, {pipeline_mode = #tpu.pipeline_mode<synchronous>, transform_indices = @transform_6, window_bounds = array<i64: 1, 160>}, {pipeline_mode = #tpu.pipeline_mode<synchronous>, transform_indices = @transform_7, window_bounds = array<i64: 32, 32>}, {pipeline_mode = #tpu.pipeline_mode<synchronous>, transform_indices = @transform_8, window_bounds = array<i64: 1, 32>}, {pipeline_mode = #tpu.pipeline_mode<synchronous>, transform_indices = @transform_9, window_bounds = array<i64: 16, 32>}]} {
    %c0 = arith.constant 0 : index
    %c0_0 = arith.constant 0 : index
    %0 = vector.load %arg1[%c0, %c0_0] : memref<16x32xf32, #tpu.memory_space<vmem>>, vector<16x32xf32>
    %c0_1 = arith.constant 0 : index
    %c0_2 = arith.constant 0 : index
    %1 = vector.load %arg6[%c0_1, %c0_2] : memref<32x160xf32, #tpu.memory_space<vmem>>, vector<32x160xf32>
    %cst = arith.constant dense<0.000000e+00> : vector<16x160xf32>
    %2 = tpu.matmul %0, %1, %cst {dimension_numbers = #tpu.dot_dimension_numbers<[1], [0], [0], [1], [0, 0, 1, 1], [], []>} : vector<16x32xf32>, vector<32x160xf32>, vector<16x160xf32> -> vector<16x160xf32>
    %c0_3 = arith.constant 0 : index
    %c0_4 = arith.constant 0 : index
    %3 = vector.load %arg7[%c0_3, %c0_4] : memref<1x160xf32, #tpu.memory_space<vmem>>, vector<1x160xf32>
    %4 = vector.broadcast %3 : vector<1x160xf32> to vector<16x160xf32>
    %5 = arith.addf %2, %4 : vector<16x160xf32>
    %c0_5 = arith.constant 0 : index
    %c0_6 = arith.constant 0 : index
    %6 = vector.load %arg4[%c0_5, %c0_6] : memref<16x32xf32, #tpu.memory_space<vmem>>, vector<16x32xf32>
    %c0_7 = arith.constant 0 : index
    %c0_8 = arith.constant 0 : index
    %7 = vector.load %arg5[%c0_7, %c0_8] : memref<16x32xf32, #tpu.memory_space<vmem>>, vector<16x32xf32>
    %8 = vector.extract_strided_slice %5 {offsets = [0, 0], sizes = [16, 32], strides = [1, 1]} : vector<16x160xf32> to vector<16x32xf32>
    %9 = arith.mulf %8, %6 : vector<16x32xf32>
    %10 = vector.extract_strided_slice %5 {offsets = [0, 32], sizes = [16, 32], strides = [1, 1]} : vector<16x160xf32> to vector<16x32xf32>
    %11 = arith.mulf %10, %7 : vector<16x32xf32>
    %12 = arith.addf %9, %11 : vector<16x32xf32>
    %13 = vector.extract_strided_slice %5 {offsets = [0, 64], sizes = [16, 32], strides = [1, 1]} : vector<16x160xf32> to vector<16x32xf32>
    %14 = arith.mulf %13, %6 : vector<16x32xf32>
    %15 = vector.extract_strided_slice %5 {offsets = [0, 96], sizes = [16, 32], strides = [1, 1]} : vector<16x160xf32> to vector<16x32xf32>
    %16 = arith.mulf %15, %7 : vector<16x32xf32>
    %17 = arith.addf %14, %16 : vector<16x32xf32>
    %18 = vector.extract_strided_slice %5 {offsets = [0, 128], sizes = [16, 32], strides = [1, 1]} : vector<16x160xf32> to vector<16x32xf32>
    %c0_9 = arith.constant 0 : index
    %c0_10 = arith.constant 0 : index
    %19 = vector.load %arg2[%c0_9, %c0_10] : memref<16x16xf32, #tpu.memory_space<vmem>>, vector<16x16xf32>
    %c0_11 = arith.constant 0 : index
    %c0_12 = arith.constant 0 : index
    %20 = vector.load %arg3[%c0_11, %c0_12] : memref<1x16xf32, #tpu.memory_space<vmem>>, vector<1x16xf32>
    %21 = vector.broadcast %20 : vector<1x16xf32> to vector<16x16xf32>
    %22 = arith.addf %19, %21 : vector<16x16xf32>
    %c0_13 = arith.constant 0 : index
    %c0_14 = arith.constant 0 : index
    %23 = vector.load %arg8[%c0_13, %c0_14] : memref<32x32xf32, #tpu.memory_space<vmem>>, vector<32x32xf32>
    %24 = vector.extract_strided_slice %12 {offsets = [0, 0], sizes = [16, 8], strides = [1, 1]} : vector<16x32xf32> to vector<16x8xf32>
    %25 = vector.extract_strided_slice %17 {offsets = [0, 0], sizes = [16, 8], strides = [1, 1]} : vector<16x32xf32> to vector<16x8xf32>
    %26 = vector.extract_strided_slice %18 {offsets = [0, 0], sizes = [16, 8], strides = [1, 1]} : vector<16x32xf32> to vector<16x8xf32>
    "tpu.trace_start"() <{level = 10 : i32, message = "qd,kd->qk"}> : () -> ()
    %cst_15 = arith.constant dense<0.000000e+00> : vector<16x16xf32>
    %27 = tpu.matmul %24, %25, %cst_15 {dimension_numbers = #tpu.dot_dimension_numbers<[1], [1], [0], [0], [0, 0, 1, 0], [], []>} : vector<16x8xf32>, vector<16x8xf32>, vector<16x16xf32> -> vector<16x16xf32>
    "tpu.trace_stop"() : () -> ()
    %cst_16 = arith.constant 0.353553385 : f32
    %28 = vector.broadcast %cst_16 : f32 to vector<16x16xf32>
    %29 = arith.mulf %27, %28 : vector<16x16xf32>
    %30 = arith.addf %29, %22 : vector<16x16xf32>
    %cst_17 = arith.constant dense<0xFF800000> : vector<16xf32>
    %31 = vector.multi_reduction <maximumf>, %30, %cst_17 [1] : vector<16x16xf32> to vector<16xf32>
    %32 = vector.shape_cast %31 : vector<16xf32> to vector<16x1xf32>
    %33 = vector.broadcast %32 : vector<16x1xf32> to vector<16x16xf32>
    %34 = arith.subf %30, %33 : vector<16x16xf32>
    %35 = math.exp %34 : vector<16x16xf32>
    %cst_18 = arith.constant dense<0.000000e+00> : vector<16xf32>
    %36 = vector.multi_reduction <add>, %35, %cst_18 [1] : vector<16x16xf32> to vector<16xf32>
    %37 = vector.shape_cast %36 : vector<16xf32> to vector<16x1xf32>
    %38 = tpu.reciprocal %37 {approx = true} : vector<16x1xf32> -> vector<16x1xf32>
    %39 = arith.mulf %37, %38 : vector<16x1xf32>
    %cst_19 = arith.constant 2.000000e+00 : f32
    %40 = vector.broadcast %cst_19 : f32 to vector<16x1xf32>
    %41 = arith.subf %40, %39 : vector<16x1xf32>
    %42 = arith.mulf %38, %41 : vector<16x1xf32>
    %43 = vector.broadcast %42 : vector<16x1xf32> to vector<16x16xf32>
    %44 = arith.mulf %35, %43 : vector<16x16xf32>
    "tpu.trace_start"() <{level = 10 : i32, message = "qk,kd->qd"}> : () -> ()
    %cst_20 = arith.constant dense<0.000000e+00> : vector<16x8xf32>
    %45 = tpu.matmul %44, %26, %cst_20 {dimension_numbers = #tpu.dot_dimension_numbers<[1], [0], [0], [1], [0, 0, 1, 1], [], []>} : vector<16x16xf32>, vector<16x8xf32>, vector<16x8xf32> -> vector<16x8xf32>
    "tpu.trace_stop"() : () -> ()
    %46 = vector.extract_strided_slice %23 {offsets = [0, 0], sizes = [8, 32], strides = [1, 1]} : vector<32x32xf32> to vector<8x32xf32>
    %cst_21 = arith.constant dense<0.000000e+00> : vector<16x32xf32>
    %47 = tpu.matmul %45, %46, %cst_21 {dimension_numbers = #tpu.dot_dimension_numbers<[1], [0], [0], [1], [0, 0, 1, 1], [], []>} : vector<16x8xf32>, vector<8x32xf32>, vector<16x32xf32> -> vector<16x32xf32>
    %48 = vector.extract_strided_slice %12 {offsets = [0, 8], sizes = [16, 8], strides = [1, 1]} : vector<16x32xf32> to vector<16x8xf32>
    %49 = vector.extract_strided_slice %17 {offsets = [0, 8], sizes = [16, 8], strides = [1, 1]} : vector<16x32xf32> to vector<16x8xf32>
    %50 = vector.extract_strided_slice %18 {offsets = [0, 8], sizes = [16, 8], strides = [1, 1]} : vector<16x32xf32> to vector<16x8xf32>
    "tpu.trace_start"() <{level = 10 : i32, message = "qd,kd->qk"}> : () -> ()
    %cst_22 = arith.constant dense<0.000000e+00> : vector<16x16xf32>
    %51 = tpu.matmul %48, %49, %cst_22 {dimension_numbers = #tpu.dot_dimension_numbers<[1], [1], [0], [0], [0, 0, 1, 0], [], []>} : vector<16x8xf32>, vector<16x8xf32>, vector<16x16xf32> -> vector<16x16xf32>
    "tpu.trace_stop"() : () -> ()
    %cst_23 = arith.constant 0.353553385 : f32
    %52 = vector.broadcast %cst_23 : f32 to vector<16x16xf32>
    %53 = arith.mulf %51, %52 : vector<16x16xf32>
    %54 = arith.addf %53, %22 : vector<16x16xf32>
    %cst_24 = arith.constant dense<0xFF800000> : vector<16xf32>
    %55 = vector.multi_reduction <maximumf>, %54, %cst_24 [1] : vector<16x16xf32> to vector<16xf32>
    %56 = vector.shape_cast %55 : vector<16xf32> to vector<16x1xf32>
    %57 = vector.broadcast %56 : vector<16x1xf32> to vector<16x16xf32>
    %58 = arith.subf %54, %57 : vector<16x16xf32>
    %59 = math.exp %58 : vector<16x16xf32>
    %cst_25 = arith.constant dense<0.000000e+00> : vector<16xf32>
    %60 = vector.multi_reduction <add>, %59, %cst_25 [1] : vector<16x16xf32> to vector<16xf32>
    %61 = vector.shape_cast %60 : vector<16xf32> to vector<16x1xf32>
    %62 = tpu.reciprocal %61 {approx = true} : vector<16x1xf32> -> vector<16x1xf32>
    %63 = arith.mulf %61, %62 : vector<16x1xf32>
    %cst_26 = arith.constant 2.000000e+00 : f32
    %64 = vector.broadcast %cst_26 : f32 to vector<16x1xf32>
    %65 = arith.subf %64, %63 : vector<16x1xf32>
    %66 = arith.mulf %62, %65 : vector<16x1xf32>
    %67 = vector.broadcast %66 : vector<16x1xf32> to vector<16x16xf32>
    %68 = arith.mulf %59, %67 : vector<16x16xf32>
    "tpu.trace_start"() <{level = 10 : i32, message = "qk,kd->qd"}> : () -> ()
    %cst_27 = arith.constant dense<0.000000e+00> : vector<16x8xf32>
    %69 = tpu.matmul %68, %50, %cst_27 {dimension_numbers = #tpu.dot_dimension_numbers<[1], [0], [0], [1], [0, 0, 1, 1], [], []>} : vector<16x16xf32>, vector<16x8xf32>, vector<16x8xf32> -> vector<16x8xf32>
    "tpu.trace_stop"() : () -> ()
    %70 = vector.extract_strided_slice %23 {offsets = [8, 0], sizes = [8, 32], strides = [1, 1]} : vector<32x32xf32> to vector<8x32xf32>
    %cst_28 = arith.constant dense<0.000000e+00> : vector<16x32xf32>
    %71 = tpu.matmul %69, %70, %cst_28 {dimension_numbers = #tpu.dot_dimension_numbers<[1], [0], [0], [1], [0, 0, 1, 1], [], []>} : vector<16x8xf32>, vector<8x32xf32>, vector<16x32xf32> -> vector<16x32xf32>
    %72 = arith.addf %47, %71 : vector<16x32xf32>
    %73 = vector.extract_strided_slice %12 {offsets = [0, 16], sizes = [16, 8], strides = [1, 1]} : vector<16x32xf32> to vector<16x8xf32>
    %74 = vector.extract_strided_slice %17 {offsets = [0, 16], sizes = [16, 8], strides = [1, 1]} : vector<16x32xf32> to vector<16x8xf32>
    %75 = vector.extract_strided_slice %18 {offsets = [0, 16], sizes = [16, 8], strides = [1, 1]} : vector<16x32xf32> to vector<16x8xf32>
    "tpu.trace_start"() <{level = 10 : i32, message = "qd,kd->qk"}> : () -> ()
    %cst_29 = arith.constant dense<0.000000e+00> : vector<16x16xf32>
    %76 = tpu.matmul %73, %74, %cst_29 {dimension_numbers = #tpu.dot_dimension_numbers<[1], [1], [0], [0], [0, 0, 1, 0], [], []>} : vector<16x8xf32>, vector<16x8xf32>, vector<16x16xf32> -> vector<16x16xf32>
    "tpu.trace_stop"() : () -> ()
    %cst_30 = arith.constant 0.353553385 : f32
    %77 = vector.broadcast %cst_30 : f32 to vector<16x16xf32>
    %78 = arith.mulf %76, %77 : vector<16x16xf32>
    %79 = arith.addf %78, %22 : vector<16x16xf32>
    %cst_31 = arith.constant dense<0xFF800000> : vector<16xf32>
    %80 = vector.multi_reduction <maximumf>, %79, %cst_31 [1] : vector<16x16xf32> to vector<16xf32>
    %81 = vector.shape_cast %80 : vector<16xf32> to vector<16x1xf32>
    %82 = vector.broadcast %81 : vector<16x1xf32> to vector<16x16xf32>
    %83 = arith.subf %79, %82 : vector<16x16xf32>
    %84 = math.exp %83 : vector<16x16xf32>
    %cst_32 = arith.constant dense<0.000000e+00> : vector<16xf32>
    %85 = vector.multi_reduction <add>, %84, %cst_32 [1] : vector<16x16xf32> to vector<16xf32>
    %86 = vector.shape_cast %85 : vector<16xf32> to vector<16x1xf32>
    %87 = tpu.reciprocal %86 {approx = true} : vector<16x1xf32> -> vector<16x1xf32>
    %88 = arith.mulf %86, %87 : vector<16x1xf32>
    %cst_33 = arith.constant 2.000000e+00 : f32
    %89 = vector.broadcast %cst_33 : f32 to vector<16x1xf32>
    %90 = arith.subf %89, %88 : vector<16x1xf32>
    %91 = arith.mulf %87, %90 : vector<16x1xf32>
    %92 = vector.broadcast %91 : vector<16x1xf32> to vector<16x16xf32>
    %93 = arith.mulf %84, %92 : vector<16x16xf32>
    "tpu.trace_start"() <{level = 10 : i32, message = "qk,kd->qd"}> : () -> ()
    %cst_34 = arith.constant dense<0.000000e+00> : vector<16x8xf32>
    %94 = tpu.matmul %93, %75, %cst_34 {dimension_numbers = #tpu.dot_dimension_numbers<[1], [0], [0], [1], [0, 0, 1, 1], [], []>} : vector<16x16xf32>, vector<16x8xf32>, vector<16x8xf32> -> vector<16x8xf32>
    "tpu.trace_stop"() : () -> ()
    %95 = vector.extract_strided_slice %23 {offsets = [16, 0], sizes = [8, 32], strides = [1, 1]} : vector<32x32xf32> to vector<8x32xf32>
    %cst_35 = arith.constant dense<0.000000e+00> : vector<16x32xf32>
    %96 = tpu.matmul %94, %95, %cst_35 {dimension_numbers = #tpu.dot_dimension_numbers<[1], [0], [0], [1], [0, 0, 1, 1], [], []>} : vector<16x8xf32>, vector<8x32xf32>, vector<16x32xf32> -> vector<16x32xf32>
    %97 = arith.addf %72, %96 : vector<16x32xf32>
    %98 = vector.extract_strided_slice %12 {offsets = [0, 24], sizes = [16, 8], strides = [1, 1]} : vector<16x32xf32> to vector<16x8xf32>
    %99 = vector.extract_strided_slice %17 {offsets = [0, 24], sizes = [16, 8], strides = [1, 1]} : vector<16x32xf32> to vector<16x8xf32>
    %100 = vector.extract_strided_slice %18 {offsets = [0, 24], sizes = [16, 8], strides = [1, 1]} : vector<16x32xf32> to vector<16x8xf32>
    "tpu.trace_start"() <{level = 10 : i32, message = "qd,kd->qk"}> : () -> ()
    %cst_36 = arith.constant dense<0.000000e+00> : vector<16x16xf32>
    %101 = tpu.matmul %98, %99, %cst_36 {dimension_numbers = #tpu.dot_dimension_numbers<[1], [1], [0], [0], [0, 0, 1, 0], [], []>} : vector<16x8xf32>, vector<16x8xf32>, vector<16x16xf32> -> vector<16x16xf32>
    "tpu.trace_stop"() : () -> ()
    %cst_37 = arith.constant 0.353553385 : f32
    %102 = vector.broadcast %cst_37 : f32 to vector<16x16xf32>
    %103 = arith.mulf %101, %102 : vector<16x16xf32>
    %104 = arith.addf %103, %22 : vector<16x16xf32>
    %cst_38 = arith.constant dense<0xFF800000> : vector<16xf32>
    %105 = vector.multi_reduction <maximumf>, %104, %cst_38 [1] : vector<16x16xf32> to vector<16xf32>
    %106 = vector.shape_cast %105 : vector<16xf32> to vector<16x1xf32>
    %107 = vector.broadcast %106 : vector<16x1xf32> to vector<16x16xf32>
    %108 = arith.subf %104, %107 : vector<16x16xf32>
    %109 = math.exp %108 : vector<16x16xf32>
    %cst_39 = arith.constant dense<0.000000e+00> : vector<16xf32>
    %110 = vector.multi_reduction <add>, %109, %cst_39 [1] : vector<16x16xf32> to vector<16xf32>
    %111 = vector.shape_cast %110 : vector<16xf32> to vector<16x1xf32>
    %112 = tpu.reciprocal %111 {approx = true} : vector<16x1xf32> -> vector<16x1xf32>
    %113 = arith.mulf %111, %112 : vector<16x1xf32>
    %cst_40 = arith.constant 2.000000e+00 : f32
    %114 = vector.broadcast %cst_40 : f32 to vector<16x1xf32>
    %115 = arith.subf %114, %113 : vector<16x1xf32>
    %116 = arith.mulf %112, %115 : vector<16x1xf32>
    %117 = vector.broadcast %116 : vector<16x1xf32> to vector<16x16xf32>
    %118 = arith.mulf %109, %117 : vector<16x16xf32>
    "tpu.trace_start"() <{level = 10 : i32, message = "qk,kd->qd"}> : () -> ()
    %cst_41 = arith.constant dense<0.000000e+00> : vector<16x8xf32>
    %119 = tpu.matmul %118, %100, %cst_41 {dimension_numbers = #tpu.dot_dimension_numbers<[1], [0], [0], [1], [0, 0, 1, 1], [], []>} : vector<16x16xf32>, vector<16x8xf32>, vector<16x8xf32> -> vector<16x8xf32>
    "tpu.trace_stop"() : () -> ()
    %120 = vector.extract_strided_slice %23 {offsets = [24, 0], sizes = [8, 32], strides = [1, 1]} : vector<32x32xf32> to vector<8x32xf32>
    %cst_42 = arith.constant dense<0.000000e+00> : vector<16x32xf32>
    %121 = tpu.matmul %119, %120, %cst_42 {dimension_numbers = #tpu.dot_dimension_numbers<[1], [0], [0], [1], [0, 0, 1, 1], [], []>} : vector<16x8xf32>, vector<8x32xf32>, vector<16x32xf32> -> vector<16x32xf32>
    %122 = arith.addf %97, %121 : vector<16x32xf32>
    %c0_43 = arith.constant 0 : index
    %c0_44 = arith.constant 0 : index
    %123 = vector.load %arg9[%c0_43, %c0_44] : memref<1x32xf32, #tpu.memory_space<vmem>>, vector<1x32xf32>
    %124 = vector.broadcast %123 : vector<1x32xf32> to vector<16x32xf32>
    %125 = arith.addf %122, %124 : vector<16x32xf32>
    %c0_45 = arith.constant 0 : index
    %c0_46 = arith.constant 0 : index
    %126 = vector.load %arg10[%c0_45, %c0_46] : memref<16x32xf32, #tpu.memory_space<vmem>>, vector<16x32xf32>
    tpu.vector_store %arg10[%c0_45, %c0_46], %125 {strides = array<i32>} : memref<16x32xf32, #tpu.memory_space<vmem>>, vector<16x32xf32>,
    return
  }
  func.func @transform_0(%arg0: i32) -> (i32, i32) {
    %c0_i32 = arith.constant 0 : i32
    %c0_i32_0 = arith.constant 0 : i32
    %c0_i32_1 = arith.constant 0 : i32
    return %c0_i32, %c0_i32_0 : i32, i32
  }
  func.func @transform_1(%arg0: i32) -> (i32, i32) {
    %c0_i32 = arith.constant 0 : i32
    %c0_i32_0 = arith.constant 0 : i32
    %c0_i32_1 = arith.constant 0 : i32
    return %c0_i32, %c0_i32_0 : i32, i32
  }
  func.func @transform_2(%arg0: i32) -> (i32, i32) {
    %c0_i32 = arith.constant 0 : i32
    %c0_i32_0 = arith.constant 0 : i32
    %c0_i32_1 = arith.constant 0 : i32
    return %c0_i32, %c0_i32_0 : i32, i32
  }
  func.func @transform_3(%arg0: i32) -> (i32, i32) {
    %c0_i32 = arith.constant 0 : i32
    %c0_i32_0 = arith.constant 0 : i32
    %c0_i32_1 = arith.constant 0 : i32
    return %c0_i32, %c0_i32_0 : i32, i32
  }
  func.func @transform_4(%arg0: i32) -> (i32, i32) {
    %c0_i32 = arith.constant 0 : i32
    %c0_i32_0 = arith.constant 0 : i32
    %c0_i32_1 = arith.constant 0 : i32
    return %c0_i32, %c0_i32_0 : i32, i32
  }
  func.func @transform_5(%arg0: i32) -> (i32, i32) {
    %c0_i32 = arith.constant 0 : i32
    %c0_i32_0 = arith.constant 0 : i32
    %c0_i32_1 = arith.constant 0 : i32
    return %c0_i32, %c0_i32_0 : i32, i32
  }
  func.func @transform_6(%arg0: i32) -> (i32, i32) {
    %c0_i32 = arith.constant 0 : i32
    %c0_i32_0 = arith.constant 0 : i32
    %c0_i32_1 = arith.constant 0 : i32
    return %c0_i32, %c0_i32_0 : i32, i32
  }
  func.func @transform_7(%arg0: i32) -> (i32, i32) {
    %c0_i32 = arith.constant 0 : i32
    %c0_i32_0 = arith.constant 0 : i32
    %c0_i32_1 = arith.constant 0 : i32
    return %c0_i32, %c0_i32_0 : i32, i32
  }
  func.func @transform_8(%arg0: i32) -> (i32, i32) {
    %c0_i32 = arith.constant 0 : i32
    %c0_i32_0 = arith.constant 0 : i32
    %c0_i32_1 = arith.constant 0 : i32
    return %c0_i32, %c0_i32_0 : i32, i32
  }
  func.func @transform_9(%arg0: i32) -> (i32, i32) {
    %c0_i32 = arith.constant 0 : i32
    %c0_i32_0 = arith.constant 0 : i32
    %c0_i32_1 = arith.constant 0 : i32
    return %c0_i32, %c0_i32_0 : i32, i32
  }
}

</mosaic_0001>

<bundles_post_ra>
// kernel: attn.1
= control target key start
LH: loop header
LB: loop body
LE: loop exit
PB: predicated region body
PF: predicated region fallthrough
CT: control target
= control target key end

     0   :  { %14 = vsyncpa [#allocation3], 0  ;;  %s2226_s0 = inlined_call_operand.hbm [shape: f32[16,32], index: 0, kind: input, shape index: {}]   ;;  %s2227_s1 = inlined_call_operand.hbm [shape: f32[16,16], index: 1, kind: input, shape index: {}]   ;;  %s2228_s2 = inlined_call_operand.vmem [shape: f32[1,16], index: 2, kind: input, shape index: {}]   ;;  %s2229_s3 = inlined_call_operand.hbm [shape: f32[16,32], index: 3, kind: input, shape index: {}]   ;;  %s2230_s4 = inlined_call_operand.hbm [shape: f32[16,32], index: 4, kind: input, shape index: {}]   ;;  %s2231_s5 = inlined_call_operand.hbm [shape: f32[32,160], index: 5, kind: input, shape index: {}]   ;;  %s2232_s6 = inlined_call_operand.vmem [shape: f32[1,160], index: 6, kind: input, shape index: {}]   ;;  %s2233_s7 = inlined_call_operand.vmem [shape: f32[32,32], index: 7, kind: input, shape index: {}]   ;;  %s2234_s8 = inlined_call_operand.vmem [shape: f32[1,32], index: 8, kind: input, shape index: {}]   ;;  %s2235_s9 = inlined_call_operand.hbm [shape: f32[16,32], index: 9, kind: output, shape index: {}]  }
   0x1   :  { %15 = vsyncpa [#allocation6], 0 }
   0x2   :  { %16 = vsyncpa [#allocation9], 0 }
   0x3   :  { %17 = vsyncpa [#allocation4], 0  ;;  %s1909_s30 = smov [#allocation5]   ;;  %s1910_s11 = smov [#allocation8]  }
   0x4   :  { %s35_s10 = sshll.u32 %s1909_s30, 4  ;;  %s61_s12 = sshll.u32 %s1910_s11, 4  ;;  %s36_s10 = int_to_ptr.vmem [resolvable:$true] %s35_s10  ;;  %s1979_s12 = int_to_ptr.vmem [resolvable:$true] %s61_s12 }
   0x5   :  { %s1769_s15 = scalar_lea.hbm %s2227_s1, 256 }
   0x6   :  { %p1770_p0 = scmp.ne.s32.totalorder %s2227_s1, %s1769_s15  ;;  %p1773_p1 = scmp.lt.u32.totalorder %s1769_s15, %s2227_s1 }
   0x8   :  { %p1775_p2 = pnand %p1773_p1, %p1770_p0 }
   0xa   :  { %1778 = shalt.err (!%p1775_p2)
}
   0xb   :  { %s1779_s20 = scalar_lea.vmem %s36_s10, 256  ;;  %p1784_p4 = scmp.lt.s32.totalorder %s36_s10, %s36_s10 }
   0xc   :  { %p1780_p3 = scmp.ne.s32.totalorder %s36_s10, %s1779_s20  ;;  %p1785_p5 = scmp.lt.s32.totalorder %s1779_s20, %s1779_s20 }
   0xe   :  { %p1786_p6 = por %p1785_p5, %p1784_p4 }
  0x10   :  { %p1787_p7 = pnand %p1786_p6, %p1780_p3 }
  0x12   :  { %1790 = shalt.err (!%p1787_p7)
}
  0x13   :  { %s1911_s21 = smov 128   ;;  %s1912_s22 = smov 8  }
  0x14   :  { %41 = dma.hbm_to_vmem [thread:$0]  %s2227_s1, 256, %s36_s10, [#allocation6], %s1911_s21, %s1911_s21, %s1912_s22  }
  0x15   :  { %s1791_s27 = scalar_lea.hbm %s2230_s4, 256 }
  0x16   :  { %p1792_p8 = scmp.ne.s32.totalorder %s2230_s4, %s1791_s27  ;;  %p1795_p9 = scmp.lt.u32.totalorder %s1791_s27, %s2230_s4 }
  0x18   :  { %p1797_p10 = pnand %p1795_p9, %p1792_p8 }
  0x1a   :  { %1800 = shalt.err (!%p1797_p10)
}
  0x1b   :  { %s1801_s13 = scalar_lea.vmem %s1979_s12, 256  ;;  %p1806_p12 = scmp.lt.s32.totalorder %s1979_s12, %s1979_s12 }
  0x1c   :  { %p1802_p11 = scmp.ne.s32.totalorder %s1979_s12, %s1801_s13  ;;  %p1807_p13 = scmp.lt.s32.totalorder %s1801_s13, %s1801_s13 }
  0x1e   :  { %p1808_p0 = por %p1807_p13, %p1806_p12 }
  0x20   :  { %p1809_p1 = pnand %p1808_p0, %p1802_p11 }
  0x22   :  { %1812 = shalt.err (!%p1809_p1)
}
  0x23   :  { %67 = dma.hbm_to_vmem [thread:$0]  %s2230_s4, 256, %s1979_s12, [#allocation9], %s1911_s21, %s1911_s21, %s1912_s22  }
  0x24   :  { %s1913_s14 = smov [#allocation2]   ;;  %s1914_s16 = smov [#allocation7]  }
  0x25   :  { %s23_s15 = sshll.u32 %s1913_s14, 4  ;;  %s49_s17 = sshll.u32 %s1914_s16, 4  ;;  %s24_s15 = int_to_ptr.vmem [resolvable:$true] %s23_s15  ;;  %s2016_s17 = int_to_ptr.vmem [resolvable:$true] %s49_s17 }
  0x26   :  { %s1813_s20 = scalar_lea.hbm %s2226_s0, 256 }
  0x27   :  { %p1814_p2 = scmp.ne.s32.totalorder %s2226_s0, %s1813_s20  ;;  %p1817_p3 = scmp.lt.u32.totalorder %s1813_s20, %s2226_s0 }
  0x29   :  { %p1819_p4 = pnand %p1817_p3, %p1814_p2 }
  0x2b   :  { %1822 = shalt.err (!%p1819_p4)
}
  0x2c   :  { %s1823_s4 = scalar_lea.vmem %s24_s15, 256  ;;  %p1828_p6 = scmp.lt.s32.totalorder %s24_s15, %s24_s15 }
  0x2d   :  { %p1824_p5 = scmp.ne.s32.totalorder %s24_s15, %s1823_s4  ;;  %p1829_p7 = scmp.lt.s32.totalorder %s1823_s4, %s1823_s4 }
  0x2f   :  { %p1830_p8 = por %p1829_p7, %p1828_p6 }
  0x31   :  { %p1831_p9 = pnand %p1830_p8, %p1824_p5 }
  0x33   :  { %1834 = shalt.err (!%p1831_p9)
}
  0x34   :  { %29 = dma.hbm_to_vmem [thread:$0]  %s2226_s0, 256, %s24_s15, [#allocation3], %s1911_s21, %s1911_s21, %s1912_s22  }
  0x35   :  { %s1835_s30 = scalar_lea.hbm %s2229_s3, 256 }
  0x36   :  { %p1836_p10 = scmp.ne.s32.totalorder %s2229_s3, %s1835_s30  ;;  %p1839_p11 = scmp.lt.u32.totalorder %s1835_s30, %s2229_s3 }
  0x38   :  { %p1841_p12 = pnand %p1839_p11, %p1836_p10 }
  0x3a   :  { %1844 = shalt.err (!%p1841_p12)
}
  0x3b   :  { %s1845_s14 = scalar_lea.vmem %s2016_s17, 256  ;;  %p1850_p0 = scmp.lt.s32.totalorder %s2016_s17, %s2016_s17 }
  0x3c   :  { %p1846_p13 = scmp.ne.s32.totalorder %s2016_s17, %s1845_s14  ;;  %p1851_p1 = scmp.lt.s32.totalorder %s1845_s14, %s1845_s14 }
  0x3e   :  { %p1852_p2 = por %p1851_p1, %p1850_p0 }
  0x40   :  { %p1853_p3 = pnand %p1852_p2, %p1846_p13 }
  0x42   :  { %1856 = shalt.err (!%p1853_p3)
}
  0x43   :  { %55 = dma.hbm_to_vmem [thread:$0]  %s2229_s3, 256, %s2016_s17, [#allocation6], %s1911_s21, %s1911_s21, %s1912_s22  }
  0x44   :  { %s1915_s16 = smov [#allocation10]   ;;  %s1857_s23 = scalar_lea.hbm %s2231_s5, 1024 }
  0x45   :  { %s73_s18 = sshll.u32 %s1915_s16, 4  ;;  %p1858_p4 = scmp.ne.s32.totalorder %s2231_s5, %s1857_s23  ;;  %s74_s18 = int_to_ptr.vmem [resolvable:$true] %s73_s18 }
  0x46   :  { %p1861_p5 = scmp.lt.u32.totalorder %s1857_s23, %s2231_s5 }
  0x48   :  { %p1863_p6 = pnand %p1861_p5, %p1858_p4 }
  0x4a   :  { %1866 = shalt.err (!%p1863_p6)
}
  0x4b   :  { %s1867_s12 = scalar_lea.vmem %s74_s18, 1024  ;;  %p1872_p8 = scmp.lt.s32.totalorder %s74_s18, %s74_s18 }
  0x4c   :  { %p1868_p7 = scmp.ne.s32.totalorder %s74_s18, %s1867_s12  ;;  %p1873_p9 = scmp.lt.s32.totalorder %s1867_s12, %s1867_s12 }
  0x4e   :  { %p1874_p10 = por %p1873_p9, %p1872_p8 }
  0x50   :  { %p1875_p11 = pnand %p1874_p10, %p1868_p7 }
  0x52   :  { %1878 = shalt.err (!%p1875_p11)
}
  0x53   :  { %s1916_s3 = smov 256   ;;  %s1917_s17 = smov 16  }
  0x54   :  { %79 = dma.hbm_to_vmem [thread:$0]  %s2231_s5, 1024, %s74_s18, [#allocation9], %s1916_s3, %s1916_s3, %s1917_s17  }
  0x55   :  { %1901 = dma.done.wait [#allocation3], 256  }
  0x56   :  { %1902 = vsyncadd [#allocation3], 4294967040 }
  0x57   :  { %1903 = dma.done.wait [#allocation6], 512  }
  0x58   :  { %1904 = vsyncadd [#allocation6], 4294966784 }
  0x59   :  { %1905 = dma.done.wait [#allocation9], 1280  }
  0x5a   :  { %1906 = vsyncadd [#allocation9], 4294966016  ;;  %v1918_v0 = vmov 0.0   ;;  %v104_v1 = vld [vmem:[#allocation10 + $0x8] sm:$0xff]  ;;  %v106_v2 = vld [vmem:[#allocation10 + $0x18] sm:$0xff]  ;;  %s1919_s5 = smov 96   ;;  %v113_v19 = vlaneseq }
  0x5b   :  { %194 = vmatprep.mubr.f32.mxu0 %v1918_v0  ;;  %v103_v3 = vld [vmem:[#allocation10] sm:$0xff]  ;;  %v1628_v4 = vpack.c.bf16 %v106_v2, %v104_v1  ;;  %v105_v5 = vld [vmem:[#allocation10 + $0x10] sm:$0xff]  ;;  %v108_v6 = vld [vmem:[#allocation10 + $0x28] sm:$0xff]  ;;  %s1920_s29 = smov 32   ;;  %vm123_vm0 = vcmask 261120   ;;  %s1921_s30 = smov 64  }
  0x5c   :  { %v110_v7 = vld [vmem:[#allocation10 + $0x38] sm:$0xff]  ;;  %v1630_v8 = vpack.c.bf16 %v105_v5, %v103_v3  ;;  %v107_v10 = vld [vmem:[#allocation10 + $0x20] sm:$0xff]  ;;  %v109_v11 = vld [vmem:[#allocation10 + $0x30] sm:$0xff]  ;;  %v114_v20 = vshrl.u32 %v113_v19, 7  ;;  %vm282_vm1 = vcmask 64512   ;;  %s1923_s1 = smov 120  }
  0x5d   :  { %v1632_v9 = vpack.c.bf16 %v110_v7, %v108_v6  ;;  %1629 = vmatprep.subr.bf16.mxu0 %v1628_v4  ;;  %v209_v12 = vld [vmem:[#allocation8] sm:$0xff]  ;;  %v1634_v13 = vpack.c.bf16 %v109_v11, %v107_v10  ;;  %v210_v14 = vld [vmem:[#allocation8 + $0x8] sm:$0xff]  ;;  %v101_v15 = vld [vmem:[#allocation2] sm:$0xff]  ;;  %vm372_vm3 = vcmask 130048   ;;  %s1925_s0 = smov 48   ;;  %s1926_s15 = smov 104  }
  0x5e   :  { %1631 = vmatpush1.bf16.msra.mxu0 %v1630_v8  ;;  %243 = vrot.lane.b32.xlu0 %v209_v12, %s1919_s5  ;;  %v207_v16 = vld [vmem:[#allocation7] sm:$0xff]  ;;  %v208_v17 = vld [vmem:[#allocation7 + $0x8] sm:$0xff]  ;;  %v115_v21 = vsub.s32 0, %v114_v20  ;;  %v119_v24 = vsub.s32 1, %v114_v20  ;;  %vm2097_vm2 = vmpackc.low %vm282_vm1, %vm282_vm1  ;;  %s1927_s16 = smov 40  }
  0x5f   :  { %1633 = vmatprep.subr.bf16.mxu0 %v1632_v9  ;;  %215 = vrot.lane.b32.xlu1 %v209_v12, %s1920_s29  ;;  %v102_v18 = vld [vmem:[#allocation2 + $0x8] sm:$0xff]  ;;  %v111_v22 = vld [vmem:[%s2232_s6] sm:$0x3]  ;;  %s1922_s6 = smov 56   ;;  %v262_v6 = vld [vmem:[#allocation5 + $0x8] sm:$0xff] }
  0x60   :  { %v116_v23 = vrot.slane %v111_v22, %v115_v21  ;;  %v120_v29 = vrot.slane %v111_v22, %v119_v24  ;;  %v1474_v7 = vld [vmem:[%s2228_s2] ss:$0 sm:$0xff]  ;;  %v261_v8 = vld [vmem:[#allocation5] sm:$0xff]  ;;  %s1924_s2 = smov 112  }
  0x61   :  { %v2116_v9 = vadd.f32 %v1474_v7, %v262_v6  ;;  %v2118_v11 = vadd.f32 %v1474_v7, %v261_v8 }
  0x62   :  { %1635 = vmatpush1.bf16.msra.mxu0 %v1634_v13  ;;  %245 = vrot.lane.b32.xlu0 %v210_v14, %s1919_s5 }
  0x63   :  { %217 = vrot.lane.b32.xlu1 %v210_v14, %s1920_s29 }
  0x65   :  { %1472 = vmatmul.mubr.msk.f32.vlgmr.msra.gmra.mrb[0].mxu0 %vm123_vm0, %v101_v15 }
  0x66   :  { %200 = vmatprep.mubr.f32.mxu0 %v1918_v0  ;;  %235 = vrot.lane.b32.xlu0 %v207_v16, %s1921_s30 }
  0x67   :  { %237 = vrot.lane.b32.xlu1 %v208_v17, %s1921_s30 }
  0x69   :  { %1473 = vmatmul.mubr.msk.f32.gmra.mrb[2].mxu0 %vm123_vm0, %v102_v18 }
  0xd0   :  { %v244_v25 = vpop.permute.xlu0 %243 }
  0xd1   :  { %v216_v31 = vpop.permute.xlu1 %215 }
  0xd4   :  { %v246_v35 = vpop.permute.xlu0 %245 }
  0xd5   :  { %v218_v42 = vpop.permute.xlu1 %217 }
  0xd8   :  { %v236_v44 = vpop.permute.xlu0 %235 }
  0xd9   :  { %v238_v45 = vpop.permute.xlu1 %237 }
 0x138   :  { %v196_v26 = vpop.f32.mrb[0].mxu0 }
 0x139   :  { %v197_v27 = vadd.f32 %v196_v26, %v116_v23  ;;  %v198_v28 = vpop.f32.mrb[1].mxu0 }
 0x13a   :  { %v199_v36 = vadd.f32 %v198_v28, %v120_v29 }
 0x13b   :  { %v249_v30 = vmul.f32 %v244_v25, %v197_v27  ;;  %v221_v39 = vmul.f32 %v216_v31, %v197_v27  ;;  %v241_v47 = vmul.f32 %v236_v44, %v197_v27  ;;  %v211_v49 = vmul.f32 %v207_v16, %v197_v27 }
 0x13c   :  { %v202_v32 = vpop.f32.mrb[2].mxu0 }
 0x13d   :  { %v203_v33 = vadd.f32 %v202_v32, %v116_v23  ;;  %v204_v34 = vpop.f32.mrb[3].mxu0  ;;  %253 = vrot.lane.b32.xlu0 %v249_v30, %s1919_s5 }
 0x13e   :  { %v205_v37 = vadd.f32 %v204_v34, %v120_v29 }
 0x13f   :  { %v250_v38 = vmul.f32 %v246_v35, %v203_v33  ;;  %v222_v43 = vmul.f32 %v218_v42, %v203_v33  ;;  %v242_v48 = vmul.f32 %v238_v45, %v203_v33  ;;  %v212_v57 = vmul.f32 %v208_v17, %v203_v33 }
 0x140   :  { %v1642_v40 = vpack.c.bf16 %v205_v37, %v199_v36  ;;  %v2075_v41 = vpack.i.bf16 %v205_v37, %v199_v36 }
 0x141   :  { %255 = vrot.lane.b32.xlu1 %v250_v38, %s1919_s5  ;;  %225 = vrot.lane.b32.xlu0 %v221_v39, %s1919_s5 }
 0x145   :  { %227 = vrot.lane.b32.xlu1 %v222_v43, %s1919_s5 }
 0x1af   :  { %v254_v46 = vpop.permute.xlu0 %253 }
 0x1b0   :  { %v259_v52 = vadd.f32 %v254_v46, %v241_v47 }
 0x1b3   :  { %v256_v50 = vpop.permute.xlu1 %255  ;;  %v226_v51 = vpop.permute.xlu0 %225 }
 0x1b4   :  { %v260_v53 = vadd.f32 %v256_v50, %v242_v48  ;;  %v2080_v54 = vadd.f32 %v226_v51, %v211_v49 }
 0x1b6   :  { %1556 = vmatprep.mubr.msk.f32.mxu1 %vm282_vm1, %v2080_v54  ;;  %v2084_v55 = vpack.i.bf16 %v260_v53, %v259_v52 }
 0x1b7   :  { %v228_v56 = vpop.permute.xlu1 %227 }
 0x1b8   :  { %1708 = vrot.lane.b32.xlu1 %v2084_v55, %s1922_s6  ;;  %1703 = vrot.lane.b32.xlu0 %v2084_v55, %s1921_s30  ;;  %v2089_v58 = vadd.f32 %v228_v56, %v212_v57 }
 0x1bc   :  { %484 = vrot.lane.b32.xlu1 %v2089_v58, %s1923_s1  ;;  %482 = vrot.lane.b32.xlu0 %v2080_v54, %s1923_s1 }
 0x22a   :  { %v1709_v59 = vpop.permute.xlu1 %1708  ;;  %v1704_v60 = vpop.permute.xlu0 %1703 }
 0x22b   :  { %v1711_v61 = vunpack.i.h.bf16 %v1709_v59  ;;  %v1710_v62 = vunpack.i.l.bf16 %v1709_v59  ;;  %v1706_v63 = vunpack.i.h.bf16 %v1704_v60  ;;  %v1705_v0 = vunpack.i.l.bf16 %v1704_v60 }
 0x22d   :  { %v1646_v2 = vpack.c.bf16 %v1711_v61, %v1710_v62  ;;  %v1636_v3 = vpack.c.bf16 %v1706_v63, %v1705_v0 }
 0x22e   :  { %v483_v4 = vpop.permute.xlu0 %482  ;;  %v485_v5 = vpop.permute.xlu1 %484 }
 0x22f   :  { %1638 = vmatprep.subr.msk.bf16.mxu1 %vm2097_vm2, %v1636_v3  ;;  %1648 = vmatprep.subr.msk.bf16.mxu0 %vm2097_vm2, %v1646_v2 }
 0x230   :  { %1570 = vmatprep.mubr.msk.f32.mxu0 %vm282_vm1, %v483_v4  ;;  %1641 = vmatpush3.bf16.xpose.msk.msra.mxu1 %vm2097_vm2, %v1636_v3 }
 0x231   :  { %1651 = vmatpush3.bf16.xpose.msk.msra.mxu0 %vm2097_vm2, %v1646_v2  ;;  %1643 = vmatprep.subr.bf16.mxu1 %v1642_v40 }
 0x237   :  { %1557 = vmatmul.mubr.msk.f32.vlgmr.msra.gmra.mrb[0].mxu1 %vm282_vm1, %v2089_v58 }
 0x238   :  { %1571 = vmatmul.mubr.msk.f32.vlgmr.msra.gmra.mrb[4].mxu0 %vm282_vm1, %v485_v5  ;;  %1645 = vmatpush3.bf16.msra.mxu1 %v1642_v40 }
 0x30a   :  { %v1558_v10 = vpop.f32.mrb[0].mxu1 }
 0x30b   :  { %v369_v12 = vmul.f32 0.35355338, %v1558_v10  ;;  %v1572_v13 = vpop.f32.mrb[4].mxu0  ;;  %v359_v14 = vpop.f32.mrb[1].mxu1  ;;  %v273_v10 = vld [vmem:[%s2233_s7 + $0x8] sm:$0xff] }
 0x30c   :  { %v368_v15 = vmul.f32 0.35355338, %v359_v14  ;;  %v564_v16 = vpop.f32.mrb[5].mxu0  ;;  %v574_v21 = vmul.f32 0.35355338, %v1572_v13 }
 0x30d   :  { %v573_v17 = vmul.f32 0.35355338, %v564_v16  ;;  %v371_v18 = vadd.f32 %v369_v12, %v2116_v9 }
 0x30e   :  { %v370_v19 = vadd.f32 %v368_v15, %v2118_v11  ;;  %v576_v25 = vadd.f32 %v574_v21, %v2116_v9 }
 0x30f   :  { %v376_v20 = vsel %vm372_vm3, %v371_v18, -inf  ;;  %v575_v23 = vadd.f32 %v573_v17, %v2118_v11 }
 0x310   :  { %377 = vmax.xlane.f32.xlu1 %v376_v20  ;;  %v373_v22 = vsel %vm372_vm3, %v370_v19, -inf  ;;  %v580_v26 = vsel %vm372_vm3, %v576_v25, -inf  ;;  %v272_v20 = vld [vmem:[%s2233_s7] sm:$0xff] }
 0x311   :  { %374 = vmax.xlane.f32.xlu0 %v373_v22  ;;  %v577_v24 = vsel %vm372_vm3, %v575_v23, -inf  ;;  %1585 = vmatprep.subr.mxu0 %v272_v20 }
 0x312   :  { %1586 = vmatpush3.msra.mxu0 %v272_v20 }
 0x315   :  { %578 = vmax.xlane.f32.xlu0 %v577_v24 }
 0x319   :  { %581 = vmax.xlane.f32.xlu0 %v580_v26 }
 0x39d   :  { %v378_v27 = vpop.xlane.xlu1 %377 }
 0x39e   :  { %v380_v28 = vsub.f32 %v371_v18, %v378_v27  ;;  %v375_v29 = vpop.xlane.xlu0 %374 }
 0x39f   :  { %v379_v30 = vsub.f32 %v370_v19, %v375_v29 }
 0x3a0   :  { %v383_v31 = vmul.f32 1.442695, %v380_v28 }
 0x3a1   :  { %v381_v32 = vmul.f32 1.442695, %v379_v30 }
 0x3a2   :  { %1737 = vpow2.f32 %v383_v31  ;;  %v579_v33 = vpop.xlane.xlu0 %578 }
 0x3a3   :  { %1739 = vpow2.f32 %v381_v32  ;;  %v583_v34 = vsub.f32 %v575_v23, %v579_v33 }
 0x3a5   :  { %v585_v35 = vmul.f32 1.442695, %v583_v34 }
 0x3a6   :  { %v582_v36 = vpop.xlane.xlu0 %581 }
 0x3a7   :  { %1741 = vpow2.f32 %v585_v35  ;;  %v584_v37 = vsub.f32 %v576_v25, %v582_v36 }
 0x3a9   :  { %v587_v38 = vmul.f32 1.442695, %v584_v37 }
 0x3ab   :  { %1743 = vpow2.f32 %v587_v38 }
 0x3ac   :  { %v1738_v39 = vpop.eup %1737 }
 0x3ad   :  { %v1740_v40 = vpop.eup %1739  ;;  %v388_v42 = vsel %vm372_vm3, %v1738_v39, 0.0 }
 0x3ae   :  { %389 = vadd.xlane.f32.xlu0 %v388_v42  ;;  %v385_v43 = vsel %vm372_vm3, %v1740_v40, 0.0 }
 0x3af   :  { %386 = vadd.xlane.f32.xlu1 %v385_v43 }
 0x3b1   :  { %v1742_v44 = vpop.eup %1741 }
 0x3b2   :  { %v589_v45 = vsel %vm372_vm3, %v1742_v44, 0.0 }
 0x3b3   :  { %590 = vadd.xlane.f32.xlu1 %v589_v45 }
 0x3b5   :  { %v1744_v46 = vpop.eup %1743 }
 0x3b6   :  { %v592_v47 = vsel %vm372_vm3, %v1744_v46, 0.0 }
 0x3b7   :  { %593 = vadd.xlane.f32.xlu0 %v592_v47 }
 0x3c4   :  { %1713 = vrot.lane.b32.xlu1 %v2075_v41, %s1923_s1 }
 0x3c8   :  { %856 = vrot.lane.b32.xlu1 %v2080_v54, %s1924_s2 }
 0x3cc   :  { %858 = vrot.lane.b32.xlu1 %v2089_v58, %s1924_s2 }
 0x3cd   :  { %1718 = vrot.lane.b32.xlu0 %v2084_v55, %s1925_s0 }
 0x3d0   :  { %1149 = vrot.lane.b32.xlu1 %v2080_v54, %s1926_s15 }
 0x3d1   :  { %1723 = vrot.lane.b32.xlu0 %v2084_v55, %s1927_s16 }
 0x3d5   :  { %1151 = vrot.lane.b32.xlu0 %v2089_v58, %s1926_s15 }
 0x43b   :  { %v390_v48 = vpop.xlane.xlu0 %389 }
 0x43c   :  { %1745 = vrcp.f32 %v390_v48  ;;  %v387_v49 = vpop.xlane.xlu1 %386 }
 0x43d   :  { %1747 = vrcp.f32 %v387_v49 }
 0x440   :  { %v591_v50 = vpop.xlane.xlu1 %590 }
 0x441   :  { %1749 = vrcp.f32 %v591_v50 }
 0x444   :  { %v1714_v51 = vpop.permute.xlu1 %1713  ;;  %v594_v52 = vpop.xlane.xlu0 %593 }
 0x445   :  { %v1716_v53 = vunpack.i.h.bf16 %v1714_v51  ;;  %v1715_v56 = vunpack.i.l.bf16 %v1714_v51  ;;  %1751 = vrcp.f32 %v594_v52 }
 0x446   :  { %v1746_v57 = vpop.eup %1745 }
 0x447   :  { %v1748_v59 = vpop.eup %1747  ;;  %v394_v54 = vmul.f32 %v1746_v57, %v390_v48  ;;  %v1652_v60 = vpack.c.bf16 %v1716_v53, %v1715_v56 }
 0x448   :  { %v393_v61 = vmul.f32 %v1748_v59, %v387_v49  ;;  %v1719_v12 = vpop.permute.xlu0 %1718  ;;  %v857_v24 = vpop.permute.xlu1 %856 }
 0x449   :  { %v396_v55 = vsub.f32 2.0, %v394_v54  ;;  %1653 = vmatprep.subr.bf16.mxu1 %v1652_v60  ;;  %v1721_v16 = vunpack.i.h.bf16 %v1719_v12  ;;  %v1720_v17 = vunpack.i.l.bf16 %v1719_v12 }
 0x44a   :  { %v395_v62 = vsub.f32 2.0, %v393_v61 }
 0x44b   :  { %v1750_v58 = vpop.eup %1749  ;;  %v398_v63 = vmul.f32 %v1746_v57, %v396_v55  ;;  %v1656_v19 = vpack.c.bf16 %v1721_v16, %v1720_v17 }
 0x44c   :  { %v397_v0 = vmul.f32 %v1748_v59, %v395_v62  ;;  %v597_v2 = vmul.f32 %v1750_v58, %v591_v50  ;;  %v1724_v23 = vpop.permute.xlu0 %1723  ;;  %v859_v30 = vpop.permute.xlu1 %858 }
 0x44d   :  { %v400_v6 = vmul.f32 %v1738_v39, %v398_v63  ;;  %v1726_v25 = vunpack.i.h.bf16 %v1724_v23  ;;  %v1725_v26 = vunpack.i.l.bf16 %v1724_v23 }
 0x44e   :  { %v399_v3 = vmul.f32 %v1740_v40, %v397_v0  ;;  %v599_v4 = vsub.f32 2.0, %v597_v2 }
 0x44f   :  { %v1752_v5 = vpop.eup %1751  ;;  %v1666_v29 = vpack.c.bf16 %v1726_v25, %v1725_v26 }
 0x450   :  { %v601_v7 = vmul.f32 %v1750_v58, %v599_v4  ;;  %v598_v8 = vmul.f32 %v1752_v5, %v594_v52  ;;  %1563 = vmatprep.mubr.msk.f32.mxu1 %vm372_vm3, %v399_v3  ;;  %v1150_v31 = vpop.permute.xlu1 %1149  ;;  %v1152_v32 = vpop.permute.xlu0 %1151 }
 0x451   :  { %1564 = vmatmul.mubr.msk.f32.vlgmr.msra.gmra.mrb[2].mxu1 %vm372_vm3, %v400_v6 }
 0x452   :  { %v603_v13 = vmul.f32 %v1742_v44, %v601_v7  ;;  %v600_v14 = vsub.f32 2.0, %v598_v8  ;;  %1655 = vmatpush3.bf16.msra.mxu1 %v1652_v60 }
 0x453   :  { %1580 = vmatprep.subr.mxu1 %v273_v10 }
 0x454   :  { %v602_v15 = vmul.f32 %v1752_v5, %v600_v14  ;;  %1577 = vmatprep.mubr.msk.f32.mxu1 %vm372_vm3, %v603_v13 }
 0x456   :  { %v604_v18 = vmul.f32 %v1744_v46, %v602_v15 }
 0x458   :  { %1578 = vmatmul.mubr.msk.f32.vlgmr.msra.gmra.mrb[4].mxu1 %vm372_vm3, %v604_v18 }
 0x459   :  { %1581 = vmatpush3.msra.mxu1 %v273_v10 }
 0x45a   :  { %1658 = vmatprep.subr.msk.bf16.mxu1 %vm2097_vm2, %v1656_v19 }
 0x524   :  { %v1565_v21 = vpop.f32.mrb[2].mxu1 }
 0x525   :  { %v473_v22 = vpop.f32.mrb[3].mxu1 }
 0x526   :  { %1587 = vmatprep.mubr.msk.f32.mxu0 %vm282_vm1, %v473_v22 }
 0x527   :  { %1588 = vmatmul.mubr.msk.f32.vlgmr.msra.gmra.mrb[6].mxu0 %vm282_vm1, %v1565_v21 }
 0x52b   :  { %v1579_v27 = vpop.f32.mrb[4].mxu1 }
 0x52c   :  { %v685_v28 = vpop.f32.mrb[5].mxu1 }
 0x52d   :  { %1582 = vmatprep.mubr.msk.f32.mxu1 %vm282_vm1, %v685_v28 }
 0x52e   :  { %1583 = vmatmul.mubr.msk.f32.vlgmr.msra.gmra.mrb[6].mxu1 %vm282_vm1, %v1579_v27 }
 0x52f   :  { %1661 = vmatpush3.bf16.xpose.msk.msra.mxu1 %vm2097_vm2, %v1656_v19  ;;  %1594 = vmatprep.mubr.msk.f32.mxu1 %vm282_vm1, %v857_v24  ;;  %v274_v24 = vld [vmem:[%s2233_s7 + $0x10] sm:$0xff] }
 0x530   :  { %1668 = vmatprep.subr.msk.bf16.mxu1 %vm2097_vm2, %v1666_v29 }
 0x536   :  { %1595 = vmatmul.mubr.msk.f32.vlgmr.msra.gmra.mrb[8].mxu1 %vm282_vm1, %v859_v30 }
 0x537   :  { %1671 = vmatpush3.bf16.xpose.msk.msra.mxu1 %vm2097_vm2, %v1666_v29  ;;  %1613 = vmatprep.mubr.msk.f32.mxu1 %vm282_vm1, %v1150_v31 }
 0x53e   :  { %1614 = vmatmul.mubr.msk.f32.vlgmr.msra.gmra.mrb[10].mxu1 %vm282_vm1, %v1152_v32 }
 0x601   :  { %v2170_v33 = vpop.f32.mrb[6].mxu1 }
 0x602   :  { %v2172_v34 = vpop.f32.mrb[7].mxu1 }
 0x609   :  { %v1596_v35 = vpop.f32.mrb[8].mxu1 }
 0x60a   :  { %v948_v36 = vmul.f32 0.35355338, %v1596_v35  ;;  %v938_v37 = vpop.f32.mrb[9].mxu1 }
 0x60b   :  { %v947_v38 = vmul.f32 0.35355338, %v938_v37 }
 0x60c   :  { %v950_v39 = vadd.f32 %v948_v36, %v2116_v9 }
 0x60d   :  { %v949_v40 = vadd.f32 %v947_v38, %v2118_v11 }
 0x60e   :  { %v954_v1 = vsel %vm372_vm3, %v950_v39, -inf }
 0x60f   :  { %955 = vmax.xlane.f32.xlu0 %v954_v1  ;;  %v951_v42 = vsel %vm372_vm3, %v949_v40, -inf }
 0x610   :  { %952 = vmax.xlane.f32.xlu1 %v951_v42 }
 0x611   :  { %v1615_v43 = vpop.f32.mrb[10].mxu1 }
 0x612   :  { %v1231_v44 = vpop.f32.mrb[11].mxu1  ;;  %v1241_v56 = vmul.f32 0.35355338, %v1615_v43  ;;  %v275_v43 = vld [vmem:[%s2233_s7 + $0x18] sm:$0xff]  ;;  %s1928_s7 = smov [#allocation11]  }
 0x613   :  { %v1240_v51 = vmul.f32 0.35355338, %v1231_v44  ;;  %s1458_s17 = sshll.u32 %s1928_s7, 4  ;;  %s1459_s17 = int_to_ptr.vmem [resolvable:$true] %s1458_s17 }
 0x614   :  { %v1243_v61 = vadd.f32 %v1241_v56, %v2116_v9  ;;  %s1879_s27 = scalar_lea.vmem %s1459_s17, 256  ;;  %p1884_p13 = scmp.lt.s32.totalorder %s1459_s17, %s1459_s17 }
 0x615   :  { %v1242_v57 = vadd.f32 %v1240_v51, %v2118_v11  ;;  %p1880_p12 = scmp.ne.s32.totalorder %s1459_s17, %s1879_s27  ;;  %p1885_p0 = scmp.lt.s32.totalorder %s1879_s27, %s1879_s27 }
 0x616   :  { %v1247_v55 = vsel %vm372_vm3, %v1243_v61, -inf }
 0x617   :  { %v1244_v60 = vsel %vm372_vm3, %v1242_v57, -inf  ;;  %p1886_p1 = por %p1885_p0, %p1884_p13 }
 0x619   :  { %p1887_p2 = pnand %p1886_p1, %p1880_p12 }
 0x69c   :  { %v956_v45 = vpop.xlane.xlu0 %955 }
 0x69d   :  { %v958_v46 = vsub.f32 %v950_v39, %v956_v45  ;;  %v953_v47 = vpop.xlane.xlu1 %952 }
 0x69e   :  { %v957_v48 = vsub.f32 %v949_v40, %v953_v47 }
 0x69f   :  { %v961_v49 = vmul.f32 1.442695, %v958_v46 }
 0x6a0   :  { %v959_v50 = vmul.f32 1.442695, %v957_v48  ;;  %v1507_v48 = vld [vmem:[%s2234_s8] ss:$0 sm:$0xff] }
 0x6a1   :  { %1753 = vpow2.f32 %v961_v49 }
 0x6a2   :  { %1755 = vpow2.f32 %v959_v50 }
 0x6ab   :  { %v1754_v52 = vpop.eup %1753 }
 0x6ac   :  { %v1756_v53 = vpop.eup %1755  ;;  %v966_v59 = vsel %vm372_vm3, %v1754_v52, 0.0 }
 0x6ad   :  { %967 = vadd.xlane.f32.xlu1 %v966_v59  ;;  %v963_v54 = vsel %vm372_vm3, %v1756_v53, 0.0 }
 0x6ae   :  { %964 = vadd.xlane.f32.xlu0 %v963_v54 }
 0x6b1   :  { %1245 = vmax.xlane.f32.xlu1 %v1244_v60 }
 0x6b5   :  { %1248 = vmax.xlane.f32.xlu1 %v1247_v55 }
 0x6c4   :  { %1728 = vrot.lane.b32.xlu0 %v2075_v41, %s1924_s2 }
 0x73a   :  { %v968_v62 = vpop.xlane.xlu1 %967 }
 0x73b   :  { %1757 = vrcp.f32 %v968_v62  ;;  %v965_v11 = vpop.xlane.xlu0 %964 }
 0x73c   :  { %1759 = vrcp.f32 %v965_v11 }
 0x73e   :  { %v1246_v58 = vpop.xlane.xlu1 %1245 }
 0x73f   :  { %v1729_v63 = vpop.permute.xlu0 %1728  ;;  %v1250_v3 = vsub.f32 %v1242_v57, %v1246_v58 }
 0x740   :  { %v1731_v0 = vunpack.i.h.bf16 %v1729_v63  ;;  %v1730_v2 = vunpack.i.l.bf16 %v1729_v63 }
 0x741   :  { %v1252_v7 = vmul.f32 1.442695, %v1250_v3 }
 0x742   :  { %v1662_v4 = vpack.c.bf16 %v1731_v0, %v1730_v2  ;;  %v1249_v5 = vpop.xlane.xlu1 %1248 }
 0x743   :  { %v1251_v6 = vsub.f32 %v1243_v61, %v1249_v5 }
 0x744   :  { %1663 = vmatprep.subr.bf16.mxu0 %v1662_v4 }
 0x745   :  { %v1758_v9 = vpop.eup %1757  ;;  %v1254_v8 = vmul.f32 1.442695, %v1251_v6  ;;  %1665 = vmatpush3.bf16.msra.mxu0 %v1662_v4 }
 0x746   :  { %v1760_v10 = vpop.eup %1759  ;;  %v972_v12 = vmul.f32 %v1758_v9, %v968_v62  ;;  %1604 = vmatprep.subr.mxu0 %v274_v24 }
 0x747   :  { %v971_v13 = vmul.f32 %v1760_v10, %v965_v11  ;;  %1761 = vpow2.f32 %v1254_v8 }
 0x748   :  { %v974_v14 = vsub.f32 2.0, %v972_v12  ;;  %1763 = vpow2.f32 %v1252_v7 }
 0x749   :  { %v973_v15 = vsub.f32 2.0, %v971_v13 }
 0x74a   :  { %v976_v16 = vmul.f32 %v1758_v9, %v974_v14 }
 0x74b   :  { %v975_v17 = vmul.f32 %v1760_v10, %v973_v15 }
 0x74c   :  { %v978_v19 = vmul.f32 %v1754_v52, %v976_v16 }
 0x74d   :  { %v977_v18 = vmul.f32 %v1756_v53, %v975_v17 }
 0x74f   :  { %1601 = vmatprep.mubr.msk.f32.mxu0 %vm372_vm3, %v977_v18 }
 0x750   :  { %1602 = vmatmul.mubr.msk.f32.vlgmr.msra.gmra.mrb[8].mxu0 %vm372_vm3, %v978_v19 }
 0x751   :  { %v1762_v20 = vpop.eup %1761  ;;  %1605 = vmatpush3.msra.mxu0 %v274_v24 }
 0x752   :  { %v1259_v21 = vsel %vm372_vm3, %v1762_v20, 0.0  ;;  %v1764_v22 = vpop.eup %1763 }
 0x753   :  { %1260 = vadd.xlane.f32.xlu1 %v1259_v21  ;;  %v1256_v23 = vsel %vm372_vm3, %v1764_v22, 0.0 }
 0x757   :  { %1257 = vadd.xlane.f32.xlu1 %v1256_v23 }
 0x768   :  { %1733 = vrot.lane.b32.xlu1 %v2075_v41, %s1926_s15 }
 0x7e0   :  { %v1261_v25 = vpop.xlane.xlu1 %1260 }
 0x7e4   :  { %v1258_v26 = vpop.xlane.xlu1 %1257 }
 0x7e5   :  { %1765 = vrcp.f32 %v1258_v26 }
 0x7e6   :  { %1767 = vrcp.f32 %v1261_v25 }
 0x7e8   :  { %v1734_v27 = vpop.permute.xlu1 %1733 }
 0x7e9   :  { %v1736_v28 = vunpack.i.h.bf16 %v1734_v27  ;;  %v1735_v29 = vunpack.i.l.bf16 %v1734_v27 }
 0x7eb   :  { %v1672_v30 = vpack.c.bf16 %v1736_v28, %v1735_v29 }
 0x7ed   :  { %1673 = vmatprep.subr.bf16.mxu0 %v1672_v30 }
 0x7ef   :  { %v1766_v31 = vpop.eup %1765 }
 0x7f0   :  { %v1768_v32 = vpop.eup %1767  ;;  %v1264_v35 = vmul.f32 %v1766_v31, %v1258_v26 }
 0x7f1   :  { %v1265_v36 = vmul.f32 %v1768_v32, %v1261_v25 }
 0x7f2   :  { %v1266_v41 = vsub.f32 2.0, %v1264_v35 }
 0x7f3   :  { %v1267_v37 = vsub.f32 2.0, %v1265_v36 }
 0x7f4   :  { %v1268_v38 = vmul.f32 %v1766_v31, %v1266_v41 }
 0x7f5   :  { %v1269_v40 = vmul.f32 %v1768_v32, %v1267_v37 }
 0x7f6   :  { %v1270_v42 = vmul.f32 %v1764_v22, %v1268_v38 }
 0x7f7   :  { %v1271_v44 = vmul.f32 %v1762_v20, %v1269_v40 }
 0x823   :  { %v1603_v39 = vpop.f32.mrb[8].mxu0 }
 0x824   :  { %v1057_v1 = vpop.f32.mrb[9].mxu0 }
 0x825   :  { %1606 = vmatprep.mubr.msk.f32.mxu0 %vm282_vm1, %v1057_v1 }
 0x826   :  { %1607 = vmatmul.mubr.msk.f32.vlgmr.msra.gmra.mrb[6].mxu0 %vm282_vm1, %v1603_v39 }
 0x827   :  { %1675 = vmatpush3.bf16.msra.mxu0 %v1672_v30  ;;  %1620 = vmatprep.mubr.msk.f32.mxu0 %vm372_vm3, %v1270_v42 }
 0x828   :  { %1623 = vmatprep.subr.mxu0 %v275_v43 }
 0x82a   :  { %1621 = vmatmul.mubr.msk.f32.vlgmr.msra.gmra.mrb[10].mxu0 %vm372_vm3, %v1271_v44 }
 0x82b   :  { %1624 = vmatpush3.msra.mxu0 %v275_v43 }
 0x8fd   :  { %v1622_v45 = vpop.f32.mrb[10].mxu0 }
 0x8fe   :  { %v1350_v46 = vpop.f32.mrb[11].mxu0 }
 0x8ff   :  { %1625 = vmatprep.mubr.msk.f32.mxu0 %vm282_vm1, %v1350_v46 }
 0x900   :  { %1626 = vmatmul.mubr.msk.f32.vlgmr.msra.gmra.mrb[6].mxu0 %vm282_vm1, %v1622_v45 }
 0x9d3   :  { %v1627_v47 = vpop.f32.mrb[6].mxu0 }
 0x9d4   :  { %v1676_v49 = vadd.f32 %v1627_v47, %v2170_v33  ;;  %v1431_v50 = vpop.f32.mrb[7].mxu0 }
 0x9d5   :  { %v1677_v51 = vadd.f32 %v1431_v50, %v2172_v34 }
 0x9d6   :  { %v1450_v52 = vadd.f32 %v1676_v49, %v1507_v48 }
 0x9d7   :  { %v1449_v53 = vadd.f32 %v1677_v51, %v1507_v48 }
 0x9d8   :  { %1452 = vst.msk [vmem:[#allocation11 + $0x8] sm:$0xff] %vm123_vm0, %v1450_v52 }
 0x9d9   :  { %1451 = vst.msk [vmem:[#allocation11] sm:$0xff] %vm123_vm0, %v1449_v53 }
 0x9da   :  { %1890 = shalt.err (!%p1887_p2)
}
 0x9db   :  { %s1891_s5 = scalar_lea.hbm %s2235_s9, 256 }
 0x9dc   :  { %p1892_p3 = scmp.ne.s32.totalorder %s2235_s9, %s1891_s5  ;;  %p1895_p4 = scmp.lt.u32.totalorder %s1891_s5, %s2235_s9 }
 0x9de   :  { %p1897_p5 = pnand %p1895_p4, %p1892_p3 }
 0x9e0   :  { %1900 = shalt.err (!%p1897_p5)
}
 0x9e1   :  { %1464 = dma.vmem_to_hbm [thread:$0]  %s1459_s17, 256, %s2235_s9, [#allocation4], %s1911_s21, %s1911_s21, %s1912_s22  }
 0x9e2   :  { %1907 = dma.done.wait [#allocation4], 256  }
 0x9e3   :  { %1908 = vsyncadd [#allocation4], 4294967040 }
 0x9e4   :  { %1468 = vsyncpa [#allocation3], 1 }
 0x9e5   :  { %1469 = vsyncpa [#allocation6], 1 }
 0x9e6   :  { %1470 = vsyncpa [#allocation9], 1 }
 0x9e7   :  { %1471 = vsyncpa [#allocation4], 1 }

</bundles_post_ra>
